<compile_context>
chip_gen: v7x
topology: tpu7x:2x2x1
jax: 0.10.0
libtpu: 0.0.40
codegen_flags: <defaults>
</compile_context>

<pallas_src>
import math
import functools

import jax
import jax.numpy as jnp
from jax import lax
from jax.experimental import pallas as pl
from jax.experimental.pallas import tpu as pltpu

NEG_INF = -1000000000.0  # same fill value as the PyTorch module


def _gate_attn_kernel(q_ref, k_ref, v_ref, w_ref, b_ref, o_ref, *,
                      scale, q_block, mxu_dtype):
    """One (batch-tile, q-tile) step: bidirectional triangular attention + gates."""
    qi = pl.program_id(1)

    q = q_ref[...]                                    # (Bt, Lq, D) f32
    k = k_ref[...]                                    # (Bt, L,  D) f32
    v = v_ref[...]                                    # (Bt, L,  D) f32
    Bt, Lq, D = q.shape
    L = k.shape[1]

    # Scale q (Bt*Lq*D multiplies) rather than the (Bt*Lq*L) score matrix,
    # then cast the MXU operands to bf16 (accumulation stays f32).
    qs = (q * scale).astype(mxu_dtype)
    kc = k.astype(mxu_dtype)
    vc = v.astype(mxu_dtype)

    # Attention scores of this q tile against all keys.
    s = jnp.einsum("bqd,bkd->bqk", qs, kc,
                   preferred_element_type=jnp.float32)        # (Bt, Lq, L) f32

    # Global row/col indices for the triangular masks (q-tile offset applied).
    row = lax.broadcasted_iota(jnp.int32, (1, Lq, L), 1) + qi * q_block
    col = lax.broadcasted_iota(jnp.int32, (1, Lq, L), 2)

    def masked_attend(allowed):
        # Per-direction masked max: matches the reference numerics and cannot
        # underflow all allowed entries (the diagonal is allowed both ways).
        s_m = jnp.where(allowed, s, NEG_INF)
        m = jnp.max(s_m, axis=-1, keepdims=True)
        p = jnp.exp(s_m - m)                                  # masked -> 0
        denom = jnp.sum(p, axis=-1, keepdims=True)            # (Bt, Lq, 1)
        pv = jnp.einsum("bqk,bkd->bqd", p.astype(mxu_dtype), vc,
                        preferred_element_type=jnp.float32)   # (Bt, Lq, D)
        # Deferred normalization: scale the (Lq, D) result, not the (Lq, L)
        # probabilities; approx reciprocal runs on the otherwise-idle EUP.
        return pv * pl.reciprocal(denom, approx=True)

    fw_v = masked_attend(col >= row)                          # attend j >= i
    bw_v = masked_attend(col <= row)                          # attend j <= i

    # v rows matching this q tile (gate input / residual mix).
    if Lq == L:
        v_q = v
    else:
        start = pl.multiple_of(qi * q_block, q_block)
        v_q = v_ref[:, pl.ds(start, Lq), :]

    # Single fused gate matmul:
    #   x = [v | fw_v | bw_v]                      (N, 3D)
    #   W = [[Win0^T Win1^T],[Wout0^T 0],[0 Wout1^T]]   (3D, 2D)
    N = Bt * Lq
    x = jnp.concatenate([v_q, fw_v, bw_v], axis=-1).reshape(N, 3 * D)
    g = jax.nn.sigmoid(
        jnp.dot(x, w_ref[...], preferred_element_type=jnp.float32)
        + b_ref[...])                                         # (N, 2D)

    pv2 = jnp.concatenate([fw_v, bw_v], axis=-1).reshape(N, 2 * D)
    v2 = jnp.concatenate([v_q, v_q], axis=-1).reshape(N, 2 * D)
    out = g * pv2 + (1.0 - g) * v2

    # Single full-tile store of the concatenated (fw_o | bw_o) output.
    o_ref[...] = out.reshape(Bt, Lq, 2 * D).astype(o_ref.dtype)


def _estimate_vmem_bytes(Bt, Lq, L, D):
    f32 = 4
    # Double-buffered pipeline blocks (q, k, v, out) + the weight blocks.
    pipelined = 2 * f32 * (Bt * Lq * D + 2 * Bt * L * D + Bt * Lq * 2 * D
                           + 3 * D * 2 * D + 2 * D)
    # Live in-kernel intermediates: a few f32/bf16 (Lq, L) score/prob tiles
    # (directions are processed sequentially) plus (Lq, {D,2D,3D}) gate tiles.
    live = Bt * (4 * Lq * L * f32 + 14 * Lq * D * f32)
    return pipelined + live


def _largest_aligned_divisor(n, cap, align=8):
    """Largest divisor of n that is <= cap and a multiple of `align`;
    falls back to n itself (always a legal block extent)."""
    if n <= cap:
        return n
    d = (cap // align) * align
    while d >= align:
        if n % d == 0:
            return d
        d -= align
    return n


def _select_tiles(bz, L, D, vmem_budget, max_q_block=512):
    Lq = _largest_aligned_divisor(L, max_q_block)
    Bt = min(bz, 8)
    while bz % Bt:
        Bt -= 1
    # Shrink the batch tile until the working set fits the VMEM budget.
    while Bt > 1 and _estimate_vmem_bytes(Bt, Lq, L, D) > vmem_budget:
        Bt -= 1
        while bz % Bt:
            Bt -= 1
    # Still too big at Bt=1: shrink the q tile (VMEM then scales ~linearly in L).
    while _estimate_vmem_bytes(Bt, Lq, L, D) > vmem_budget and Lq > 8:
        nxt = _largest_aligned_divisor(L, Lq // 2)
        if nxt >= Lq:
            break
        Lq = nxt
    # Guarantee >= 2 grid steps on the parallel axes so a 2-TensorCore part
    # (v7x megacore) can shard the work instead of idling one core.
    if bz // Bt == 1 and L // Lq == 1 and bz > 1:
        Bt = max(1, bz // 2)
        while bz % Bt:
            Bt -= 1
    return Bt, Lq


def gate_dot_product_attention(q, k, v, params, *,
                               batch_block=None, q_block=None,
                               mxu_dtype=jnp.bfloat16):
    """q, k, v: (bz, L, D) float32.  Returns (bz, L, 2*D)."""
    bz, L, D = q.shape
    scale = 1.0 / math.sqrt(D)

    # Per-generation VMEM sizing (v7x: 64 MiB/TC, v5e/v6e: 128 MiB; default
    # scoped limits are 16-32 MiB, so raise vmem_limit_bytes explicitly).
    try:
        cap_bytes = int(pltpu.get_tpu_info().vmem_capacity_bytes)
    except Exception:
        cap_bytes = 64 << 20          # safe floor (v7x per-TensorCore VMEM)
    vmem_limit = min(int(cap_bytes * 0.85), 100 << 20)
    vmem_budget = int(cap_bytes * 0.6)

    auto_bt, auto_lq = _select_tiles(bz, L, D, vmem_budget)
    Bt = batch_block if batch_block else auto_bt
    Bt = max(1, min(Bt, bz))
    while bz % Bt:
        Bt -= 1
    Lq = q_block if q_block else auto_lq
    if L % Lq or (Lq != L and Lq % 8):
        Lq = auto_lq
    grid = (bz // Bt, L // Lq)

    # Fused gate weight (one (3D, 2D) matmul replaces both gate matmuls):
    #   rows [0:D)   -> [Win0^T | Win1^T]   (applied to v)
    #   rows [D:2D)  -> [Wout0^T |   0   ]  (applied to fw_v)
    #   rows [2D:3D) -> [  0    | Wout1^T]  (applied to bw_v)
    dt = params["win0"].dtype
    zero = jnp.zeros((D, D), dt)
    w_fused = jnp.concatenate([
        jnp.concatenate([params["win0"].T, params["win1"].T], axis=1),
        jnp.concatenate([params["wout0"].T, zero], axis=1),
        jnp.concatenate([zero, params["wout1"].T], axis=1),
    ], axis=0)                                                    # (3D, 2D)
    # TODO(synk): on v5e with D > 64 the zero blocks are real extra MXU passes
    # (128-wide MXU); split back into two (D, D) out-gate matmuls there.
    b_cat = jnp.concatenate([params["b0"], params["b1"]]).reshape(1, 2 * D)

    kernel = functools.partial(_gate_attn_kernel, scale=scale,
                               q_block=Lq, mxu_dtype=mxu_dtype)

    # TODO(synk): the constant-index weight specs could use
    # pipeline_mode=pl.Buffered(1) to reclaim one VMEM copy when D is large.
    return pl.pallas_call(
        kernel,
        out_shape=jax.ShapeDtypeStruct((bz, L, 2 * D), q.dtype),
        grid=grid,
        in_specs=[
            pl.BlockSpec((Bt, Lq, D), lambda b, i: (b, i, 0)),    # q (tiled on L)
            pl.BlockSpec((Bt, L, D), lambda b, i: (b, 0, 0)),     # k (full L)
            pl.BlockSpec((Bt, L, D), lambda b, i: (b, 0, 0)),     # v (full L)
            pl.BlockSpec((3 * D, 2 * D), lambda b, i: (0, 0)),    # fused gate W
            pl.BlockSpec((1, 2 * D), lambda b, i: (0, 0)),        # fused bias
        ],
        out_specs=pl.BlockSpec((Bt, Lq, 2 * D), lambda b, i: (b, i, 0)),
        compiler_params=pltpu.CompilerParams(
            dimension_semantics=("parallel", "parallel"),
            vmem_limit_bytes=vmem_limit),
    )(q, k, v, w_fused, b_cat)


def _reference(q, k, v, params):
    """Plain-JAX reference mirroring the PyTorch forward (eval mode)."""
    D = q.shape[-1]
    scale = 1.0 / math.sqrt(D)
    s = jnp.einsum("bqd,bkd->bqk", q, k) * scale
    L = s.shape[-1]
    row = jnp.arange(L)[:, None]
    col = jnp.arange(L)[None, :]
    fw_s = jnp.where(row > col, NEG_INF, s)
    bw_s = jnp.where(col > row, NEG_INF, s)
    fw_w = jax.nn.softmax(fw_s, axis=-1)
    bw_w = jax.nn.softmax(bw_s, axis=-1)
    fw_v = jnp.einsum("bqk,bkd->bqd", fw_w, v)
    bw_v = jnp.einsum("bqk,bkd->bqd", bw_w, v)
    g_fw = jax.nn.sigmoid(v @ params["win0"].T + fw_v @ params["wout0"].T + params["b0"])
    g_bw = jax.nn.sigmoid(v @ params["win1"].T + bw_v @ params["wout1"].T + params["b1"])
    fw_o = g_fw * fw_v + (1 - g_fw) * v
    bw_o = g_bw * bw_v + (1 - g_bw) * v
    return jnp.concatenate([fw_o, bw_o], axis=-1)


def init_params(key, k_dim):
    """Deterministic nn.Linear-style init: U(-1/sqrt(in), 1/sqrt(in))."""
    bound = 1.0 / math.sqrt(k_dim)
    ks = jax.random.split(key, 6)
    u = lambda kk, shape: jax.random.uniform(kk, shape, jnp.float32, -bound, bound)
    return {
        "win0": u(ks[0], (k_dim, k_dim)),   # in_gates[0].weight  (out, in)
        "win1": u(ks[1], (k_dim, k_dim)),   # in_gates[1].weight
        "wout0": u(ks[2], (k_dim, k_dim)),  # out_gates[0].weight
        "wout1": u(ks[3], (k_dim, k_dim)),  # out_gates[1].weight
        "b0": u(ks[4], (k_dim,)),           # out_gates[0].bias
        "b1": u(ks[5], (k_dim,)),           # out_gates[1].bias
    }


if __name__ == "__main__":
    # Small shapes consistent with the module: q_len == kv_len == L, v_dim == k_dim == D.
    bz, L, D = 4, 16, 32
    key = jax.random.PRNGKey(0)
    kq, kk, kv, kp = jax.random.split(key, 4)
    q = jax.random.normal(kq, (bz, L, D), jnp.float32)
    k = jax.random.normal(kk, (bz, L, D), jnp.float32)
    v = jax.random.normal(kv, (bz, L, D), jnp.float32)
    params = init_params(kp, D)

    out = gate_dot_product_attention(q, k, v, params)
    out = jax.block_until_ready(out)

    ref = _reference(q, k, v, params)
    assert out.shape == (bz, L, 2 * D)
    # Tolerance covers bf16 MXU operands (f32 accumulation) and the approx
    # EUP reciprocal in the deferred softmax normalization (~1e-3 rel each).
    assert jnp.allclose(out, ref, atol=3e-2, rtol=3e-2), \
        float(jnp.max(jnp.abs(out - ref)))

    print("KERNEL_OK")
</pallas_src>

<mosaic_0001>
module attributes {stable_mosaic.version = 11 : i64} {
  func.func @_gate_attn_kernel(%arg0: i32, %arg1: i32, %arg2: memref<2x16x32xf32, #tpu.memory_space<vmem>>, %arg3: memref<2x16x32xf32, #tpu.memory_space<vmem>>, %arg4: memref<2x16x32xf32, #tpu.memory_space<vmem>>, %arg5: memref<96x64xf32, #tpu.memory_space<vmem>>, %arg6: memref<1x64xf32, #tpu.memory_space<vmem>>, %arg7: memref<2x16x64xf32, #tpu.memory_space<vmem>>) attributes {dimension_semantics = [#tpu.dimension_semantics<parallel>, #tpu.dimension_semantics<parallel>], iteration_bounds = array<i64: 2, 1>, scalar_prefetch = 0 : i64, scratch_operands = 0 : i64, tpu.core_type = #tpu.core_type<tc>, window_params = [{transform_indices = @transform_0, window_bounds = array<i64: 2, 16, 32>}, {transform_indices = @transform_1, window_bounds = array<i64: 2, 16, 32>}, {transform_indices = @transform_2, window_bounds = array<i64: 2, 16, 32>}, {pipeline_mode = #tpu.pipeline_mode<synchronous>, transform_indices = @transform_3, window_bounds = array<i64: 96, 64>}, {pipeline_mode = #tpu.pipeline_mode<synchronous>, transform_indices = @transform_4, window_bounds = array<i64: 1, 64>}, {transform_indices = @transform_5, window_bounds = array<i64: 2, 16, 64>}]} {
    %c0 = arith.constant 0 : index
    %c0_0 = arith.constant 0 : index
    %c0_1 = arith.constant 0 : index
    %0 = vector.load %arg2[%c0, %c0_0, %c0_1] : memref<2x16x32xf32, #tpu.memory_space<vmem>>, vector<2x16x32xf32>
    %c0_2 = arith.constant 0 : index
    %c0_3 = arith.constant 0 : index
    %c0_4 = arith.constant 0 : index
    %1 = vector.load %arg3[%c0_2, %c0_3, %c0_4] : memref<2x16x32xf32, #tpu.memory_space<vmem>>, vector<2x16x32xf32>
    %c0_5 = arith.constant 0 : index
    %c0_6 = arith.constant 0 : index
    %c0_7 = arith.constant 0 : index
    %2 = vector.load %arg4[%c0_5, %c0_6, %c0_7] : memref<2x16x32xf32, #tpu.memory_space<vmem>>, vector<2x16x32xf32>
    %cst = arith.constant 0.176776692 : f32
    %3 = vector.broadcast %cst : f32 to vector<2x16x32xf32>
    %4 = arith.mulf %0, %3 : vector<2x16x32xf32>
    %5 = arith.truncf %4 : vector<2x16x32xf32> to vector<2x16x32xbf16>
    %6 = arith.truncf %1 : vector<2x16x32xf32> to vector<2x16x32xbf16>
    %7 = arith.truncf %2 : vector<2x16x32xf32> to vector<2x16x32xbf16>
    "tpu.trace_start"() <{level = 10 : i32, message = "bqd,bkd->bqk"}> : () -> ()
    %cst_8 = arith.constant dense<0.000000e+00> : vector<2x16x16xf32>
    %8 = tpu.matmul %5, %6, %cst_8 {dimension_numbers = #tpu.dot_dimension_numbers<[2], [2], [1], [1], [0, 0, 0, 1, 1, 1], [0], [0]>} : vector<2x16x32xbf16>, vector<2x16x32xbf16>, vector<2x16x16xf32> -> vector<2x16x16xf32>
    "tpu.trace_stop"() : () -> ()
    %9 = tpu.iota {dimensions = array<i32: 1>} : vector<1x16x16xi32>
    %c16_i32 = arith.constant 16 : i32
    %10 = arith.muli %arg1, %c16_i32 : i32
    %11 = vector.broadcast %10 : i32 to vector<1x16x16xi32>
    %12 = arith.addi %9, %11 : vector<1x16x16xi32>
    %13 = tpu.iota {dimensions = array<i32: 2>} : vector<1x16x16xi32>
    %14 = arith.cmpi sge, %13, %12 : vector<1x16x16xi32>
    %cst_9 = arith.constant -1.000000e+09 : f32
    %15 = vector.shape_cast %14 : vector<1x16x16xi1> to vector<1x16x16xi1>
    %16 = vector.broadcast %15 : vector<1x16x16xi1> to vector<2x16x16xi1>
    %17 = vector.broadcast %cst_9 : f32 to vector<2x16x16xf32>
    %18 = arith.select %16, %8, %17 : vector<2x16x16xi1>, vector<2x16x16xf32>
    %cst_10 = arith.constant dense<0xFF800000> : vector<2x16xf32>
    %19 = vector.multi_reduction <maximumf>, %18, %cst_10 [2] : vector<2x16x16xf32> to vector<2x16xf32>
    %20 = vector.shape_cast %19 : vector<2x16xf32> to vector<2x16x1xf32>
    %21 = vector.broadcast %20 : vector<2x16x1xf32> to vector<2x16x16xf32>
    %22 = arith.subf %18, %21 : vector<2x16x16xf32>
    %23 = math.exp %22 : vector<2x16x16xf32>
    %cst_11 = arith.constant dense<0.000000e+00> : vector<2x16xf32>
    %24 = vector.multi_reduction <add>, %23, %cst_11 [2] : vector<2x16x16xf32> to vector<2x16xf32>
    %25 = vector.shape_cast %24 : vector<2x16xf32> to vector<2x16x1xf32>
    %26 = arith.truncf %23 : vector<2x16x16xf32> to vector<2x16x16xbf16>
    "tpu.trace_start"() <{level = 10 : i32, message = "bqk,bkd->bqd"}> : () -> ()
    %cst_12 = arith.constant dense<0.000000e+00> : vector<2x16x32xf32>
    %27 = tpu.matmul %26, %7, %cst_12 {dimension_numbers = #tpu.dot_dimension_numbers<[2], [1], [1], [2], [0, 0, 0, 1, 1, 2], [0], [0]>} : vector<2x16x16xbf16>, vector<2x16x32xbf16>, vector<2x16x32xf32> -> vector<2x16x32xf32>
    "tpu.trace_stop"() : () -> ()
    %28 = tpu.reciprocal %25 {approx = true} : vector<2x16x1xf32> -> vector<2x16x1xf32>
    %29 = vector.broadcast %28 : vector<2x16x1xf32> to vector<2x16x32xf32>
    %30 = arith.mulf %27, %29 : vector<2x16x32xf32>
    %31 = arith.cmpi sle, %13, %12 : vector<1x16x16xi32>
    %cst_13 = arith.constant -1.000000e+09 : f32
    %32 = vector.shape_cast %31 : vector<1x16x16xi1> to vector<1x16x16xi1>
    %33 = vector.broadcast %32 : vector<1x16x16xi1> to vector<2x16x16xi1>
    %34 = vector.broadcast %cst_13 : f32 to vector<2x16x16xf32>
    %35 = arith.select %33, %8, %34 : vector<2x16x16xi1>, vector<2x16x16xf32>
    %cst_14 = arith.constant dense<0xFF800000> : vector<2x16xf32>
    %36 = vector.multi_reduction <maximumf>, %35, %cst_14 [2] : vector<2x16x16xf32> to vector<2x16xf32>
    %37 = vector.shape_cast %36 : vector<2x16xf32> to vector<2x16x1xf32>
    %38 = vector.broadcast %37 : vector<2x16x1xf32> to vector<2x16x16xf32>
    %39 = arith.subf %35, %38 : vector<2x16x16xf32>
    %40 = math.exp %39 : vector<2x16x16xf32>
    %cst_15 = arith.constant dense<0.000000e+00> : vector<2x16xf32>
    %41 = vector.multi_reduction <add>, %40, %cst_15 [2] : vector<2x16x16xf32> to vector<2x16xf32>
    %42 = vector.shape_cast %41 : vector<2x16xf32> to vector<2x16x1xf32>
    %43 = arith.truncf %40 : vector<2x16x16xf32> to vector<2x16x16xbf16>
    "tpu.trace_start"() <{level = 10 : i32, message = "bqk,bkd->bqd"}> : () -> ()
    %cst_16 = arith.constant dense<0.000000e+00> : vector<2x16x32xf32>
    %44 = tpu.matmul %43, %7, %cst_16 {dimension_numbers = #tpu.dot_dimension_numbers<[2], [1], [1], [2], [0, 0, 0, 1, 1, 2], [0], [0]>} : vector<2x16x16xbf16>, vector<2x16x32xbf16>, vector<2x16x32xf32> -> vector<2x16x32xf32>
    "tpu.trace_stop"() : () -> ()
    %45 = tpu.reciprocal %42 {approx = true} : vector<2x16x1xf32> -> vector<2x16x1xf32>
    %46 = vector.broadcast %45 : vector<2x16x1xf32> to vector<2x16x32xf32>
    %47 = arith.mulf %44, %46 : vector<2x16x32xf32>
    %48 = tpu.concatenate %2, %30, %47 in 2 : vector<2x16x32xf32>, vector<2x16x32xf32>, vector<2x16x32xf32> -> vector<2x16x96xf32>
    %49 = vector.shape_cast %48 : vector<2x16x96xf32> to vector<32x96xf32>
    %c0_17 = arith.constant 0 : index
    %c0_18 = arith.constant 0 : index
    %50 = vector.load %arg5[%c0_17, %c0_18] : memref<96x64xf32, #tpu.memory_space<vmem>>, vector<96x64xf32>
    %cst_19 = arith.constant dense<0.000000e+00> : vector<32x64xf32>
    %51 = tpu.matmul %49, %50, %cst_19 {dimension_numbers = #tpu.dot_dimension_numbers<[1], [0], [0], [1], [0, 0, 1, 1], [], []>} : vector<32x96xf32>, vector<96x64xf32>, vector<32x64xf32> -> vector<32x64xf32>
    %c0_20 = arith.constant 0 : index
    %c0_21 = arith.constant 0 : index
    %52 = vector.load %arg6[%c0_20, %c0_21] : memref<1x64xf32, #tpu.memory_space<vmem>>, vector<1x64xf32>
    %53 = vector.broadcast %52 : vector<1x64xf32> to vector<32x64xf32>
    %54 = arith.addf %51, %53 : vector<32x64xf32>
    %55 = arith.negf %54 : vector<32x64xf32>
    %56 = math.exp %55 : vector<32x64xf32>
    %cst_22 = arith.constant 1.000000e+00 : f32
    %57 = vector.broadcast %cst_22 : f32 to vector<32x64xf32>
    %58 = arith.addf %57, %56 : vector<32x64xf32>
    %59 = arith.divf %57, %58 : vector<32x64xf32>
    %60 = tpu.concatenate %30, %47 in 2 : vector<2x16x32xf32>, vector<2x16x32xf32> -> vector<2x16x64xf32>
    %61 = vector.shape_cast %60 : vector<2x16x64xf32> to vector<32x64xf32>
    %62 = tpu.concatenate %2, %2 in 2 : vector<2x16x32xf32>, vector<2x16x32xf32> -> vector<2x16x64xf32>
    %63 = vector.shape_cast %62 : vector<2x16x64xf32> to vector<32x64xf32>
    %64 = arith.mulf %59, %61 : vector<32x64xf32>
    %cst_23 = arith.constant 1.000000e+00 : f32
    %65 = vector.broadcast %cst_23 : f32 to vector<32x64xf32>
    %66 = arith.subf %65, %59 : vector<32x64xf32>
    %67 = arith.mulf %66, %63 : vector<32x64xf32>
    %68 = arith.addf %64, %67 : vector<32x64xf32>
    %69 = vector.shape_cast %68 : vector<32x64xf32> to vector<2x16x64xf32>
    %c0_24 = arith.constant 0 : index
    %c0_25 = arith.constant 0 : index
    %c0_26 = arith.constant 0 : index
    %70 = vector.load %arg7[%c0_24, %c0_25, %c0_26] : memref<2x16x64xf32, #tpu.memory_space<vmem>>, vector<2x16x64xf32>
    tpu.vector_store %arg7[%c0_24, %c0_25, %c0_26], %69 {strides = array<i32>} : memref<2x16x64xf32, #tpu.memory_space<vmem>>, vector<2x16x64xf32>,
    return
  }
  func.func @transform_0(%arg0: i32, %arg1: i32) -> (i32, i32, i32) {
    %c0_i32 = arith.constant 0 : i32
    %c0_i32_0 = arith.constant 0 : i32
    return %arg0, %arg1, %c0_i32 : i32, i32, i32
  }
  func.func @transform_1(%arg0: i32, %arg1: i32) -> (i32, i32, i32) {
    %c0_i32 = arith.constant 0 : i32
    %c0_i32_0 = arith.constant 0 : i32
    %c0_i32_1 = arith.constant 0 : i32
    return %arg0, %c0_i32, %c0_i32_0 : i32, i32, i32
  }
  func.func @transform_2(%arg0: i32, %arg1: i32) -> (i32, i32, i32) {
    %c0_i32 = arith.constant 0 : i32
    %c0_i32_0 = arith.constant 0 : i32
    %c0_i32_1 = arith.constant 0 : i32
    return %arg0, %c0_i32, %c0_i32_0 : i32, i32, i32
  }
  func.func @transform_3(%arg0: i32, %arg1: i32) -> (i32, i32) {
    %c0_i32 = arith.constant 0 : i32
    %c0_i32_0 = arith.constant 0 : i32
    %c0_i32_1 = arith.constant 0 : i32
    return %c0_i32, %c0_i32_0 : i32, i32
  }
  func.func @transform_4(%arg0: i32, %arg1: i32) -> (i32, i32) {
    %c0_i32 = arith.constant 0 : i32
    %c0_i32_0 = arith.constant 0 : i32
    %c0_i32_1 = arith.constant 0 : i32
    return %c0_i32, %c0_i32_0 : i32, i32
  }
  func.func @transform_5(%arg0: i32, %arg1: i32) -> (i32, i32, i32) {
    %c0_i32 = arith.constant 0 : i32
    %c0_i32_0 = arith.constant 0 : i32
    return %arg0, %arg1, %c0_i32 : i32, i32, i32
  }
}

</mosaic_0001>

<bundles_post_ra>
// kernel: tpu_custom_call.1
= control target key start
LH: loop header
LB: loop body
LE: loop exit
PB: predicated region body
PF: predicated region fallthrough
CT: control target
= control target key end

     0   :  { %10 = vsyncpa [#allocation3], 0  ;;  %s1899_s0 = inlined_call_operand.vmem [shape: f32[4,16,32], index: 0, kind: input, shape index: {}]   ;;  %s1900_s1 = inlined_call_operand.vmem [shape: f32[4,16,32], index: 1, kind: input, shape index: {}]   ;;  %s1901_s2 = inlined_call_operand.hbm [shape: f32[4,16,32], index: 2, kind: input, shape index: {}]   ;;  %s1902_s3 = inlined_call_operand.vmem [shape: f32[96,64], index: 3, kind: input, shape index: {}]   ;;  %s1903_s4 = inlined_call_operand.vmem [shape: f32[1,64], index: 4, kind: input, shape index: {}]   ;;  %s1904_s5 = inlined_call_operand.hbm [shape: f32[4,16,64], index: 5, kind: output, shape index: {}]  }
   0x1   :  { %12 = vsyncpa [#allocation3 + $0x1], 0 }
   0x2   :  { %13 = vsyncpa [#allocation4], 0 }
   0x3   :  { %15 = vsyncpa [#allocation4 + $0x1], 0  ;;  %s1546_s18 = smov 0   ;;  %s1548_s19 = smov 0  }
   0x4   :  { %s1550_s20 = smov 0   ;;  %s1552_s21 = smov 0  }
   0x5   :  { %s1554_s22 = smov 0   ;;  %s1556_s23 = smov 0  }
   0x6 LB: > { %s1112_s24 = sadd.s32 4294967295, %s1504_s23   ;;  %s1113_s25 = sadd.s32 4294967294, %s1504_s23   ;;  %s1504_s23 = sphi %s1556_s23, %s21_s23   ;;  %s1500_s22 = sphi %s1554_s22, %s1919_s22   ;;  %s1496_s21 = sphi %s1552_s21, %s1918_s21   ;;  %s1492_s20 = sphi %s1550_s20, %s1917_s20   ;;  %s1488_s19 = sphi %s1548_s19, %s1916_s19   ;;  %s1484_s18 = sphi %s1546_s18, %s1915_s18  }
   0x7   : > { %s33_s26 = sadd.s32 1, %s1500_s22  ;;  %s94_s27 = sadd.s32 1, %s1492_s20 }
   0x8   : > { %p35_p0 = scmp.ge.s32.totalorder %s33_s26, 2  ;;  %p101_p1 = scmp.ne.s32.totalorder %s1492_s20, %s1488_s19 }
   0x9   : > { %p102_p2 = scmp.eq.s32.totalorder %s1504_s23, 0  ;;  %p107_p3 = scmp.ne.s32.totalorder %s1488_s19, %s1484_s18 }
   0xa   : > { %s1921_s26 = smov (%p35_p0, %s33_s26), 0  ;;  %p108_p5 = scmp.eq.s32.totalorder %s1112_s24, 0 }
   0xb   : > { %p1587_p4 = por %p102_p2, %p101_p1  ;;  %s91_s29 = ssub.s32 %s1500_s22, %s1921_s26 }
   0xc   : > { %p175_p6 = scmp.eq.s32.totalorder %s1112_s24, 1  ;;  %p92_p7 = scmp.eq.s32.totalorder %s91_s29, 0 }
   0xd   : > { %p1593_p8 = por %p108_p5, %p107_p3  ;;  %p181_p10 = scmp.eq.s32.totalorder %s1113_s25, 1 }
   0xe   : > { %p1597_p9 = por %p175_p6, %p101_p1  ;;  %p1286_p13 = scmp.lt.s32.totalorder %s1504_s23, 2 }
   0xf   : > { %s1602_s7 = scalar_select %p92_p7, %s1492_s20, %s94_s27  }
  0x10   : > { %s1908_s6 = scalar_select %p1597_p9, 1, 0 }
  0x11   : > { %p1604_p11 = por %p181_p10, %p107_p3  ;;  %s232_s9 = sand.u32 1, %s1492_s20  }
  0x12   : > { %s1116_s10 = sshll.u32 %s232_s9, 5  ;;  %s1151_s11 = sshll.u32 %s1500_s22, 9 }
  0x13   : > { %s1909_s8 = scalar_select %p1604_p11, 1, 0 }
  0x14   : > { %s1615_s14 = scalar_lea.hbm %s1901_s2, %s1151_s11  ;;  %s236_s15 = scalar_lea.vmem [#allocation2], %s1116_s10 }
  0x15   : > { %s244_s16 = sshll.u32 %s236_s15, 4  ;;  %p1621_p0 = pnand %p1286_p13, %p1587_p4  ;;  %s1617_s16 = int_to_ptr.vmem [resolvable:$true] %s244_s16 }
  0x16   : > { %s1626_s24 = scalar_lea.sflag [#allocation3], %s232_s9  ;;  %s1392_s25 = scalar_lea.hbm %s1615_s14, 512 }
  0x17   : > { %p1393_p2 = scmp.ne.s32.totalorder %s1615_s14, %s1392_s25  ;;  %p1394_p3 = pneg %p1621_p0 }
  0x18   : > { %s1397_s28 = scalar_lea.hbm %s1901_s2, 1024  ;;  %p1398_p4 = scmp.lt.u32.totalorder %s1615_s14, %s1901_s2 }
  0x19   : > { %p1395_p5 = pnand %p1394_p3, %p1393_p2  ;;  %p1399_p7 = scmp.lt.u32.totalorder %s1397_s28, %s1392_s25 }
  0x1a   : > { %p1401_p13 = scmp.lt.u32.totalorder %s1392_s25, %s1615_s14 }
  0x1b   : > { %p1396_p6 = pneg %p1395_p5  ;;  %p1400_p10 = por %p1399_p7, %p1398_p4 }
  0x1d   : > { %p1402_p12 = por %p1401_p13, %p1400_p10 }
  0x1f   : > { %p1403_p1 = pnand %p1402_p12, %p1396_p6 }
  0x21   : > { %1406 = shalt.err (!%p1403_p1)
}
  0x22   : > { %s1407_s9 = scalar_lea.vmem %s1617_s16, 512  ;;  %s1506_s12 = smov [#allocation2]  }
  0x23   : > { %p1408_p2 = scmp.ne.s32.totalorder %s1617_s16, %s1407_s9  ;;  %s1412_s13 = sshll.u32 %s1506_s12, 4  ;;  %s1413_s13 = int_to_ptr.vmem [resolvable:$false] %s1412_s13 }
  0x24   : > { %s1414_s15 = scalar_lea.vmem %s1413_s13, 1024  ;;  %p1415_p9 = scmp.lt.s32.totalorder %s1617_s16, %s1413_s13 }
  0x25   : > { %p1410_p5 = pnand %p1408_p2, %p1394_p3  ;;  %p1416_p4 = scmp.lt.s32.totalorder %s1414_s15, %s1407_s9 }
  0x27   : > { %p1411_p11 = pneg %p1410_p5  ;;  %p1417_p7 = por %p1416_p4, %p1415_p9 }
  0x29   : > { %p1418_p10 = pnand %p1417_p7, %p1411_p11 }
  0x2b   : > { %1421 = shalt.err (!%p1418_p10)
}
  0x2c   : > { %s1507_s25 = smov 128   ;;  %s1508_s27 = smov 8  }
  0x2d   : > { %1281 = dma.hbm_to_vmem [thread:$0]  (!%p1621_p0), %s1615_s14, 512, %s1617_s16, %s1626_s24, %s1507_s25, %s1507_s25, %s1508_s27  }
  0x2e   : > { %p252_p12 = scmp.lt.s32.totalorder %s1504_s23, 3  ;;  %p1911_p1 = scmp.ge.s32.totalorder %s1504_s23, 1 }
  0x30   : > { %p253_p3 = pnand %p1911_p1, %p252_p12 }
  0x31   : > { %s1658_s29 = sand.u32 (!%p253_p3), 1, %s1488_s19  }
  0x32   : > { %256 = sbr.rel (%p253_p3) target bundleno = 1068 (0x42c), region = 40  ;;  %s1121_s28 = sshll.u32 (!%p253_p3), %s1658_s29, 5 }
  0x33   : > { %s259_s10 = scalar_lea.sflag (!%p253_p3), [#allocation3], %s1658_s29  ;;  %s1664_s11 = scalar_lea.vmem (!%p253_p3), [#allocation2], %s1121_s28 }
  0x39   : > { %1475 = dma.done.wait (%p1593_p8), %s259_s10, 512  }
  0x3a   : > { %1477 = vsyncadd (%p1593_p8), %s259_s10, 4294966784  ;;  %s1123_s14 = sshll.u32 %s1496_s21, 1  ;;  %v1509_v0 = vmov 0.0   ;;  %vm1510_vm0 = vmmov 0   ;;  %vm350_vm1 = vcmask 261120   ;;  %v445_v19 = vlaneseq  ;;  %v1706_v47 = vld [vmem:[%s1664_s11] sm:$0xff] }
  0x3b   : > { %1184 = vmatprep.subr.bf16.mxu1 %v1509_v0  ;;  %p307_p9 = scmp.lt.s32.totalorder %s1123_s14, 3  ;;  %1186 = vmatprep.mubr.msk.bf16.mxu1 %vm1510_vm0, %v1509_v0  ;;  %vm464_vm3 = vcmask 130048   ;;  %v1709_v48 = vld [vmem:[%s1664_s11 + $0x8] sm:$0xff]  ;;  %v1715_v50 = vld [vmem:[%s1664_s11 + $0x10] sm:$0xff]  ;;  %v1718_v51 = vld [vmem:[%s1664_s11 + $0x18] sm:$0xff]  ;;  %s1511_s12 = smov 32  }
  0x3c   : > { %1196 = vmatprep.subr.bf16.mxu0 %v1509_v0  ;;  %1198 = vmatprep.mubr.msk.bf16.mxu0 %vm1510_vm0, %v1509_v0  ;;  %v446_v20 = vshrl.u32 %v445_v19, 7  ;;  %v453_v21 = vand.u32 127, %v445_v19  ;;  %v348_v49 = vpack.c.bf16 %v1709_v48, %v1706_v47  ;;  %v349_v52 = vpack.c.bf16 %v1718_v51, %v1715_v50  ;;  %s304_s27 = scalar_lea.vmem [#allocation5], %s1121_s28  ;;  %s1155_s10 = sshll.u32 %s1496_s21, 9 }
  0x3d   : > { %s1923_s14 = smov (!%p307_p9, %s1123_s14), 3  ;;  %vm779_vm7 = vcmask 523264   ;;  %vm803_vm8 = vcmask 785408   ;;  %s998_s28 = sshll.u32 %s304_s27, 4  ;;  %s1848_s28 = int_to_ptr.vmem [resolvable:$true] %s998_s28 }
  0x3e   : > { %s1152_s16 = sshll.u32 %s1923_s14, 4  ;;  %v447_v22 = vadd.s32 8, %v446_v20  ;;  %vm454_vm2 = vcmp.ge.s32.totalorder %v453_v21, %v446_v20  ;;  %vm599_vm5 = vcmp.le.s32.totalorder %v453_v21, %v446_v20  ;;  %1197 = vmatpush3.bf16.msra.mxu0 %v348_v49  ;;  %s982_s21 = scalar_lea.sflag [#allocation4], %s1658_s29 }
  0x3f   : > { %s314_s24 = scalar_lea.vmem %s1899_s0, %s1152_s16  ;;  %s322_s13 = scalar_lea.vmem %s1900_s1, %s1152_s16  ;;  %1208 = vmatprep.subr.bf16.mxu0 %v1509_v0 }
  0x40   : > { %v332_v1 = vld [vmem:[%s322_s13] sm:$0xff]  ;;  %v333_v2 = vld [vmem:[%s322_s13 + $0x8] sm:$0xff]  ;;  %v334_v6 = vld [vmem:[%s322_s13 + $0x10] sm:$0xff]  ;;  %vm455_vm4 = vcmp.ge.s32.totalorder %v453_v21, %v447_v22  ;;  %vm600_vm6 = vcmp.le.s32.totalorder %v453_v21, %v447_v22  ;;  %s1846_s16 = scalar_lea.hbm %s1904_s5, %s1155_s10  ;;  %s1422_s17 = scalar_lea.vmem %s1848_s28, 512 }
  0x41   : > { %v328_v3 = vld [vmem:[%s314_s24] sm:$0xff]  ;;  %v346_v4 = vpack.c.bf16 %v333_v2, %v332_v1  ;;  %v329_v5 = vld [vmem:[%s314_s24 + $0x8] sm:$0xff]  ;;  %v335_v7 = vld [vmem:[%s322_s13 + $0x18] sm:$0xff]  ;;  %s1512_s13 = smov 64   ;;  %p1423_p8 = scmp.ne.s32.totalorder %s1848_s28, %s1422_s17 }
  0x42   : > { %v340_v9 = vmul.f32 0.17677669, %v328_v3  ;;  %v341_v10 = vmul.f32 0.17677669, %v329_v5  ;;  %v347_v11 = vpack.c.bf16 %v335_v7, %v334_v6  ;;  %v330_v13 = vld [vmem:[%s314_s24 + $0x10] sm:$0xff]  ;;  %v331_v14 = vld [vmem:[%s314_s24 + $0x18] sm:$0xff] }
  0x43   : > { %v355_v8 = vsel %vm350_vm1, %v346_v4, 0  ;;  %v342_v16 = vmul.f32 0.17677669, %v330_v13  ;;  %v343_v17 = vmul.f32 0.17677669, %v331_v14  ;;  %p1912_p11 = scmp.ne.s32.totalorder %s1908_s6, 0 }
  0x44   : > { %1185 = vmatpush3.bf16.xpose.msra.mxu1 %v355_v8  ;;  %v344_v12 = vpack.c.bf16 %v341_v10, %v340_v9  ;;  %v402_v15 = vsel %vm350_vm1, %v347_v11, 0  ;;  %s1513_s30 = smov [#allocation5]  }
  0x45   : > { %1190 = vmatprep.subr.bf16.mxu1 %v1509_v0  ;;  %v345_v18 = vpack.c.bf16 %v343_v17, %v342_v16  ;;  %p1424_p0 = pnand %p1423_p8, %p1912_p11  ;;  %s1426_s24 = sshll.u32 %s1513_s30, 4  ;;  %s1427_s24 = int_to_ptr.vmem [resolvable:$false] %s1426_s24 }
  0x46   : > { %s1428_s9 = scalar_lea.vmem %s1427_s24, 1024  ;;  %p1429_p13 = scmp.lt.s32.totalorder %s1848_s28, %s1427_s24 }
  0x47   : > { %p1425_p6 = pneg %p1424_p0  ;;  %p1430_p2 = scmp.lt.s32.totalorder %s1428_s9, %s1422_s17 }
  0x49   : > { %p1431_p5 = por %p1430_p2, %p1429_p13 }
  0x4b   : > { %1187 = vmatmul.mubr.msk.bf16.vlgmr.msra.gmra.mrb[0].mxu1 %vm350_vm1, %v344_v12  ;;  %p1432_p4 = pnand %p1431_p5, %p1425_p6 }
  0x4c   : > { %1191 = vmatpush3.bf16.xpose.msra.mxu1 %v402_v15  ;;  %1192 = vmatprep.mubr.msk.bf16.mxu1 %vm1510_vm0, %v1509_v0 }
  0x4d   : > { %1202 = vmatprep.subr.bf16.mxu1 %v1509_v0 }
  0x53   : > { %1193 = vmatmul.mubr.msk.bf16.vlgmr.msra.gmra.mrb[4].mxu1 %vm350_vm1, %v345_v18 }
  0x54   : > { %1204 = vmatprep.mubr.msk.bf16.mxu1 %vm1510_vm0, %v1509_v0  ;;  %1203 = vmatpush3.bf16.msra.mxu1 %v349_v52 }
  0x55   : > { %1214 = vmatprep.subr.bf16.mxu1 %v1509_v0 }
 0x11e   : > { %v391_v23 = vpop.f32.mrb[0].mxu1 }
 0x11f   : > { %v1188_v24 = vpop.f32.mrb[1].mxu1  ;;  %v460_v25 = vsel %vm454_vm2, %v391_v23, -1e+09  ;;  %v605_v31 = vsel %vm599_vm5, %v391_v23, -1e+09 }
 0x120   : > { %v394_v26 = vpop.f32.mrb[2].mxu1  ;;  %v465_v27 = vsel %vm464_vm3, %v460_v25, -inf  ;;  %v609_v36 = vsel %vm464_vm3, %v605_v31, -inf }
 0x121   : > { %466 = vmax.xlane.f32.xlu0 %v465_v27  ;;  %v1189_v28 = vpop.f32.mrb[3].mxu1  ;;  %v461_v29 = vsel %vm455_vm4, %v394_v26, -1e+09  ;;  %v606_v43 = vsel %vm600_vm6, %v394_v26, -1e+09 }
 0x122   : > { %v468_v30 = vsel %vm464_vm3, %v461_v29, -inf  ;;  %v612_v44 = vsel %vm464_vm3, %v606_v43, -inf }
 0x125   : > { %469 = vmax.xlane.f32.xlu0 %v468_v30 }
 0x126   : > { %v438_v32 = vpop.f32.mrb[4].mxu1 }
 0x127   : > { %v1194_v33 = vpop.f32.mrb[5].mxu1  ;;  %v462_v34 = vsel %vm454_vm2, %v438_v32, -1e+09  ;;  %v607_v39 = vsel %vm599_vm5, %v438_v32, -1e+09 }
 0x128   : > { %v441_v35 = vpop.f32.mrb[6].mxu1  ;;  %v471_v37 = vsel %vm464_vm3, %v462_v34, -inf  ;;  %v615_v41 = vsel %vm464_vm3, %v607_v39, -inf }
 0x129   : > { %610 = vmax.xlane.f32.xlu0 %v609_v36  ;;  %472 = vmax.xlane.f32.xlu1 %v471_v37  ;;  %v1195_v38 = vpop.f32.mrb[7].mxu1  ;;  %v463_v40 = vsel %vm455_vm4, %v441_v35, -1e+09  ;;  %v608_v45 = vsel %vm600_vm6, %v441_v35, -1e+09  ;;  %v786_v35 = vld [vmem:[%s1902_s3 + $0x10] sm:$0xff] }
 0x12a   : > { %v474_v42 = vsel %vm464_vm3, %v463_v40, -inf  ;;  %v618_v46 = vsel %vm464_vm3, %v608_v45, -inf  ;;  %v787_v37 = vld [vmem:[%s1902_s3 + $0x18] sm:$0xff] }
 0x12b   : > { %v1254_v38 = vpack.c.bf16 %v787_v37, %v786_v35 }
 0x12d   : > { %616 = vmax.xlane.f32.xlu0 %v615_v41  ;;  %475 = vmax.xlane.f32.xlu1 %v474_v42  ;;  %v788_v41 = vld [vmem:[%s1902_s3 + $0x20] sm:$0xff]  ;;  %v789_v42 = vld [vmem:[%s1902_s3 + $0x28] sm:$0xff] }
 0x131   : > { %613 = vmax.xlane.f32.xlu1 %v612_v44  ;;  %v1258_v44 = vpack.c.bf16 %v789_v42, %v788_v41 }
 0x135   : > { %619 = vmax.xlane.f32.xlu1 %v618_v46  ;;  %v791_v46 = vld [vmem:[%s1902_s3 + $0x38] sm:$0xff] }
 0x1ae   : > { %v467_v53 = vpop.xlane.xlu0 %466 }
 0x1af   : > { %v477_v54 = vsub.f32 %v460_v25, %v467_v53  ;;  %v792_v53 = vld [vmem:[%s1902_s3 + $0x40] sm:$0xff] }
 0x1b1   : > { %v481_v55 = vmul.f32 1.442695, %v477_v54  ;;  %v793_v54 = vld [vmem:[%s1902_s3 + $0x48] sm:$0xff] }
 0x1b2   : > { %v470_v56 = vpop.xlane.xlu0 %469 }
 0x1b3   : > { %1344 = vpow2.f32 %v481_v55  ;;  %v478_v57 = vsub.f32 %v461_v29, %v470_v56  ;;  %v1266_v55 = vpack.c.bf16 %v793_v54, %v792_v53 }
 0x1b5   : > { %v483_v58 = vmul.f32 1.442695, %v478_v57 }
 0x1b6   : > { %v611_v59 = vpop.xlane.xlu0 %610  ;;  %v473_v60 = vpop.xlane.xlu1 %472 }
 0x1b7   : > { %1346 = vpow2.f32 %v483_v58  ;;  %v621_v61 = vsub.f32 %v605_v31, %v611_v59  ;;  %v479_v62 = vsub.f32 %v462_v34, %v473_v60  ;;  %v784_v34 = vld [vmem:[%s1902_s3] sm:$0xff] }
 0x1b9   : > { %v625_v63 = vmul.f32 1.442695, %v621_v61  ;;  %v485_v1 = vmul.f32 1.442695, %v479_v62  ;;  %v794_v61 = vld [vmem:[%s1902_s3 + $0x50] sm:$0xff]  ;;  %v795_v62 = vld [vmem:[%s1902_s3 + $0x58] sm:$0xff] }
 0x1ba   : > { %v617_v2 = vpop.xlane.xlu0 %616  ;;  %v476_v3 = vpop.xlane.xlu1 %475 }
 0x1bb   : > { %1348 = vpow2.f32 %v625_v63  ;;  %v623_v4 = vsub.f32 %v607_v39, %v617_v2  ;;  %v480_v5 = vsub.f32 %v463_v40, %v476_v3  ;;  %v1270_v2 = vpack.c.bf16 %v795_v62, %v794_v61 }
 0x1bc   : > { %1350 = vpow2.f32 %v485_v1 }
 0x1bd   : > { %v1345_v6 = vpop.eup %1344  ;;  %v629_v7 = vmul.f32 1.442695, %v623_v4  ;;  %v487_v8 = vmul.f32 1.442695, %v480_v5 }
 0x1be   : > { %v614_v9 = vpop.xlane.xlu1 %613  ;;  %v489_v10 = vsel %vm464_vm3, %v1345_v6, 0.0 }
 0x1bf   : > { %v622_v11 = vsub.f32 %v606_v43, %v614_v9  ;;  %490 = vadd.xlane.f32.xlu0 %v489_v10  ;;  %1352 = vpow2.f32 %v487_v8 }
 0x1c0   : > { %1354 = vpow2.f32 %v629_v7 }
 0x1c1   : > { %v1347_v12 = vpop.eup %1346  ;;  %v627_v13 = vmul.f32 1.442695, %v622_v11 }
 0x1c2   : > { %v620_v14 = vpop.xlane.xlu1 %619  ;;  %v492_v15 = vsel %vm464_vm3, %v1347_v12, 0.0  ;;  %v501_v16 = vpack.c.bf16 %v1347_v12, %v1345_v6 }
 0x1c3   : > { %1356 = vpow2.f32 %v627_v13  ;;  %v624_v17 = vsub.f32 %v608_v45, %v620_v14  ;;  %493 = vadd.xlane.f32.xlu1 %v492_v15  ;;  %v790_v45 = vld [vmem:[%s1902_s3 + $0x30] sm:$0xff] }
 0x1c4   : > { %1199 = vmatmul.mubr.msk.bf16.vlgmr.msra.gmra.mrb[0].mxu0 %vm464_vm3, %v501_v16 }
 0x1c5   : > { %v1349_v18 = vpop.eup %1348  ;;  %v631_v19 = vmul.f32 1.442695, %v624_v17  ;;  %1209 = vmatpush3.bf16.msra.mxu0 %v348_v49  ;;  %1210 = vmatprep.mubr.msk.bf16.mxu0 %vm1510_vm0, %v1509_v0  ;;  %v1262_v49 = vpack.c.bf16 %v791_v46, %v790_v45 }
 0x1c6   : > { %v633_v20 = vsel %vm464_vm3, %v1349_v18, 0.0  ;;  %v1351_v21 = vpop.eup %1350 }
 0x1c7   : > { %1358 = vpow2.f32 %v631_v19  ;;  %634 = vadd.xlane.f32.xlu0 %v633_v20  ;;  %v495_v23 = vsel %vm464_vm3, %v1351_v21, 0.0 }
 0x1c9   : > { %v1353_v22 = vpop.eup %1352 }
 0x1ca   : > { %v1355_v24 = vpop.eup %1354  ;;  %v502_v25 = vpack.c.bf16 %v1353_v22, %v1351_v21  ;;  %v498_v31 = vsel %vm464_vm3, %v1353_v22, 0.0 }
 0x1cb   : > { %496 = vadd.xlane.f32.xlu0 %v495_v23  ;;  %v639_v27 = vsel %vm464_vm3, %v1355_v24, 0.0 }
 0x1cc   : > { %1205 = vmatmul.mubr.msk.bf16.vlgmr.msra.gmra.mrb[8].mxu1 %vm464_vm3, %v502_v25 }
 0x1cd   : > { %v1357_v26 = vpop.eup %1356  ;;  %1215 = vmatpush3.bf16.msra.mxu1 %v349_v52  ;;  %1216 = vmatprep.mubr.msk.bf16.mxu1 %vm1510_vm0, %v1509_v0  ;;  %v785_v0 = vld [vmem:[%s1902_s3 + $0x8] sm:$0xff] }
 0x1ce   : > { %v636_v28 = vsel %vm464_vm3, %v1357_v26, 0.0  ;;  %v645_v29 = vpack.c.bf16 %v1357_v26, %v1349_v18  ;;  %v1250_v36 = vpack.c.bf16 %v785_v0, %v784_v34 }
 0x1cf   : > { %640 = vadd.xlane.f32.xlu0 %v639_v27  ;;  %637 = vadd.xlane.f32.xlu1 %v636_v28 }
 0x1d0   : > { %1211 = vmatmul.mubr.msk.bf16.vlgmr.msra.gmra.mrb[4].mxu0 %vm464_vm3, %v645_v29  ;;  %1251 = vmatprep.subr.bf16.mxu0 %v1250_v36 }
 0x1d1   : > { %v1359_v30 = vpop.eup %1358  ;;  %1253 = vmatpush3.bf16.msra.mxu0 %v1250_v36 }
 0x1d2   : > { %v646_v32 = vpack.c.bf16 %v1359_v30, %v1355_v24  ;;  %v642_v33 = vsel %vm464_vm3, %v1359_v30, 0.0  ;;  %1255 = vmatprep.subr.bf16.mxu0 %v1254_v38 }
 0x1d3   : > { %499 = vadd.xlane.f32.xlu1 %v498_v31 }
 0x1d4   : > { %1217 = vmatmul.mubr.msk.bf16.vlgmr.msra.gmra.mrb[12].mxu1 %vm464_vm3, %v646_v32 }
 0x1d5   : > { %1257 = vmatpush3.bf16.msra.mxu0 %v1254_v38 }
 0x1d6   : > { %1259 = vmatprep.subr.bf16.mxu0 %v1258_v44 }
 0x1d7   : > { %643 = vadd.xlane.f32.xlu1 %v642_v33 }
 0x1d9   : > { %1261 = vmatpush3.bf16.msra.mxu0 %v1258_v44 }
 0x1da   : > { %1263 = vmatprep.subr.bf16.mxu0 %v1262_v49 }
 0x1dd   : > { %1265 = vmatpush3.bf16.msra.mxu0 %v1262_v49  ;;  %v1135_v49 = vld [vmem:[%s1903_s4] ss:$0 sm:$0xff] }
 0x1de   : > { %1267 = vmatprep.subr.bf16.mxu0 %v1266_v55 }
 0x1e1   : > { %1269 = vmatpush3.bf16.msra.mxu0 %v1266_v55 }
 0x1e2   : > { %1271 = vmatprep.subr.bf16.mxu0 %v1270_v2 }
 0x1e5   : > { %1273 = vmatpush3.bf16.msra.mxu0 %v1270_v2 }
 0x24c   : > { %v491_v39 = vpop.xlane.xlu0 %490 }
 0x24d   : > { %1360 = vrcp.f32 %v491_v39 }
 0x250   : > { %v494_v40 = vpop.xlane.xlu1 %493 }
 0x251   : > { %1362 = vrcp.f32 %v494_v40 }
 0x254   : > { %v635_v43 = vpop.xlane.xlu0 %634 }
 0x257   : > { %v1361_v57 = vpop.eup %1360 }
 0x258   : > { %v497_v52 = vpop.xlane.xlu0 %496 }
 0x259   : > { %1364 = vrcp.f32 %v497_v52 }
 0x25a   : > { %1366 = vrcp.f32 %v635_v43 }
 0x25b   : > { %v1363_v63 = vpop.eup %1362 }
 0x25c   : > { %v638_v56 = vpop.xlane.xlu1 %637  ;;  %v641_v5 = vpop.xlane.xlu0 %640 }
 0x25d   : > { %1368 = vrcp.f32 %v638_v56 }
 0x25e   : > { %1370 = vrcp.f32 %v641_v5 }
 0x260   : > { %v500_v6 = vpop.xlane.xlu1 %499 }
 0x261   : > { %1372 = vrcp.f32 %v500_v6 }
 0x263   : > { %v1365_v7 = vpop.eup %1364 }
 0x264   : > { %v644_v11 = vpop.xlane.xlu1 %643  ;;  %v1367_v13 = vpop.eup %1366 }
 0x265   : > { %1374 = vrcp.f32 %v644_v11 }
 0x267   : > { %v1369_v20 = vpop.eup %1368 }
 0x268   : > { %v1371_v21 = vpop.eup %1370 }
 0x26b   : > { %v1373_v27 = vpop.eup %1372 }
 0x26f   : > { %v1375_v30 = vpop.eup %1374 }
 0x297   : > { %v540_v58 = vpop.f32.mrb[0].mxu0 }
 0x298   : > { %v1769_v59 = vmul.f32 %v1361_v57, %v540_v58  ;;  %v1200_v60 = vpop.f32.mrb[1].mxu0 }
 0x299   : > { %v543_v1 = vpop.f32.mrb[2].mxu0 }
 0x29a   : > { %v1777_v3 = vmul.f32 %v1363_v63, %v543_v1  ;;  %v1201_v4 = vpop.f32.mrb[3].mxu0  ;;  %747 = vrot.lane.b32.xlu0 %v1769_v59, %s1511_s12 }
 0x29c   : > { %749 = vrot.lane.b32.xlu1 %v1777_v3, %s1511_s12 }
 0x29f   : > { %v584_v8 = vpop.f32.mrb[8].mxu1 }
 0x2a0   : > { %v1783_v9 = vmul.f32 %v1365_v7, %v584_v8  ;;  %v1206_v10 = vpop.f32.mrb[9].mxu1 }
 0x2a1   : > { %v587_v12 = vpop.f32.mrb[10].mxu1 }
 0x2a2   : > { %751 = vrot.lane.b32.xlu0 %v1783_v9, %s1511_s12  ;;  %v1207_v14 = vpop.f32.mrb[11].mxu1  ;;  %v1787_v29 = vmul.f32 %v1373_v27, %v587_v12 }
 0x2a3   : > { %v684_v15 = vpop.f32.mrb[4].mxu0 }
 0x2a4   : > { %v739_v16 = vmul.f32 %v1367_v13, %v684_v15  ;;  %v1212_v17 = vpop.f32.mrb[5].mxu0 }
 0x2a5   : > { %v687_v18 = vpop.f32.mrb[6].mxu0 }
 0x2a6   : > { %v1213_v19 = vpop.f32.mrb[7].mxu0  ;;  %763 = vrot.lane.b32.xlu1 %v739_v16, %s1512_s13  ;;  %v740_v22 = vmul.f32 %v1369_v20, %v687_v18 }
 0x2a7   : > { %v728_v23 = vpop.f32.mrb[12].mxu1 }
 0x2a8   : > { %v741_v24 = vmul.f32 %v1371_v21, %v728_v23  ;;  %v1218_v25 = vpop.f32.mrb[13].mxu1 }
 0x2a9   : > { %v731_v26 = vpop.f32.mrb[14].mxu1 }
 0x2aa   : > { %765 = vrot.lane.b32.xlu1 %v740_v22, %s1512_s13  ;;  %767 = vrot.lane.b32.xlu0 %v741_v24, %s1512_s13  ;;  %v1219_v28 = vpop.f32.mrb[15].mxu1  ;;  %v742_v31 = vmul.f32 %v1375_v30, %v731_v26 }
 0x2ae   : > { %753 = vrot.lane.b32.xlu1 %v1787_v29, %s1511_s12  ;;  %925 = vrot.lane.b32.xlu0 %v739_v16, %s1511_s12 }
 0x2b2   : > { %769 = vrot.lane.b32.xlu1 %v742_v31, %s1512_s13  ;;  %929 = vrot.lane.b32.xlu0 %v741_v24, %s1511_s12 }
 0x2b6   : > { %927 = vrot.lane.b32.xlu1 %v740_v22, %s1511_s12  ;;  %945 = vrot.lane.b32.xlu0 %v1706_v47, %s1511_s12 }
 0x2ba   : > { %947 = vrot.lane.b32.xlu1 %v1709_v48, %s1511_s12  ;;  %949 = vrot.lane.b32.xlu0 %v1715_v50, %s1511_s12 }
 0x2be   : > { %931 = vrot.lane.b32.xlu1 %v742_v31, %s1511_s12 }
 0x2c2   : > { %951 = vrot.lane.b32.xlu1 %v1718_v51, %s1511_s12 }
 0x30c   : > { %v748_v33 = vpop.permute.xlu0 %747 }
 0x30d   : > { %v775_v34 = vsel %vm350_vm1, %v1706_v47, %v748_v33 }
 0x30e   : > { %v750_v32 = vpop.permute.xlu1 %749 }
 0x30f   : > { %v776_v37 = vsel %vm350_vm1, %v1709_v48, %v750_v32 }
 0x314   : > { %v752_v35 = vpop.permute.xlu0 %751 }
 0x315   : > { %v777_v39 = vsel %vm350_vm1, %v1715_v50, %v752_v35 }
 0x318   : > { %v764_v0 = vpop.permute.xlu1 %763 }
 0x319   : > { %v780_v36 = vsel %vm779_vm7, %v775_v34, %v764_v0 }
 0x31a   : > { %1244 = vmatprep.mubr.msk.f32.mxu0 %vm803_vm8, %v780_v36 }
 0x31c   : > { %v766_v38 = vpop.permute.xlu1 %765  ;;  %v768_v41 = vpop.permute.xlu0 %767 }
 0x31d   : > { %v781_v40 = vsel %vm779_vm7, %v776_v37, %v766_v38  ;;  %v782_v42 = vsel %vm779_vm7, %v777_v39, %v768_v41 }
 0x31e   : > { %1245 = vmatmul.mubr.msk.f32.vlgmr.msra.gmra.mrb[8].mxu0 %vm803_vm8, %v781_v40 }
 0x31f   : > { %1247 = vmatprep.mubr.msk.f32.mxu0 %vm803_vm8, %v782_v42 }
 0x320   : > { %v754_v43 = vpop.permute.xlu1 %753  ;;  %v926_v5 = vpop.permute.xlu0 %925 }
 0x321   : > { %v778_v44 = vsel %vm350_vm1, %v1718_v51, %v754_v43  ;;  %v937_v25 = vsel %vm350_vm1, %v1769_v59, %v926_v5 }
 0x324   : > { %v770_v45 = vpop.permute.xlu1 %769  ;;  %v930_v10 = vpop.permute.xlu0 %929 }
 0x325   : > { %v783_v46 = vsel %vm779_vm7, %v778_v44, %v770_v45  ;;  %v939_v37 = vsel %vm350_vm1, %v1783_v9, %v930_v10 }
 0x326   : > { %1248 = vmatmul.mubr.msk.f32.gmra.mrb[10].mxu0 %vm803_vm8, %v783_v46 }
 0x328   : > { %v928_v7 = vpop.permute.xlu1 %927  ;;  %v946_v16 = vpop.permute.xlu0 %945 }
 0x329   : > { %v957_v22 = vsel %vm350_vm1, %v1706_v47, %v946_v16  ;;  %v938_v23 = vsel %vm350_vm1, %v1777_v3, %v928_v7 }
 0x32c   : > { %v948_v12 = vpop.permute.xlu1 %947  ;;  %v950_v33 = vpop.permute.xlu0 %949 }
 0x32d   : > { %v958_v18 = vsel %vm350_vm1, %v1709_v48, %v948_v12  ;;  %v959_v0 = vsel %vm350_vm1, %v1715_v50, %v950_v33 }
 0x330   : > { %v932_v20 = vpop.permute.xlu1 %931 }
 0x331   : > { %v940_v35 = vsel %vm350_vm1, %v1787_v29, %v932_v20 }
 0x334   : > { %v952_v31 = vpop.permute.xlu1 %951 }
 0x335   : > { %v960_v3 = vsel %vm350_vm1, %v1718_v51, %v952_v31 }
 0x3f1   : > { %v1246_v52 = vpop.f32.mrb[8].mxu0 }
 0x3f2   : > { %v888_v53 = vadd.f32 %v1246_v52, %v1135_v49  ;;  %v882_v54 = vpop.f32.mrb[9].mxu0 }
 0x3f3   : > { %v883_v55 = vadd.f32 %v1135_v49, %v882_v54 }
 0x3f4   : > { %v1141_v56 = vmul.f32 -1.442695, %v888_v53 }
 0x3f5   : > { %v1140_v57 = vmul.f32 -1.442695, %v883_v55 }
 0x3f6   : > { %1376 = vpow2.f32 %v1141_v56 }
 0x3f7   : > { %1378 = vpow2.f32 %v1140_v57 }
 0x3f9   : > { %v1249_v58 = vpop.f32.mrb[10].mxu0 }
 0x3fa   : > { %v898_v60 = vadd.f32 %v1249_v58, %v1135_v49  ;;  %v892_v61 = vpop.f32.mrb[11].mxu0 }
 0x3fb   : > { %v893_v62 = vadd.f32 %v1135_v49, %v892_v61 }
 0x3fc   : > { %v1143_v63 = vmul.f32 -1.442695, %v898_v60 }
 0x3fd   : > { %v1142_v1 = vmul.f32 -1.442695, %v893_v62 }
 0x3fe   : > { %1380 = vpow2.f32 %v1143_v63 }
 0x3ff   : > { %1382 = vpow2.f32 %v1142_v1 }
 0x400   : > { %v1377_v2 = vpop.eup %1376 }
 0x401   : > { %v1379_v4 = vpop.eup %1378  ;;  %v914_v6 = vadd.f32 1.0, %v1377_v2 }
 0x402   : > { %v913_v8 = vadd.f32 1.0, %v1379_v4 }
 0x403   : > { %1384 = vrcp.f32 %v914_v6 }
 0x404   : > { %1386 = vrcp.f32 %v913_v8 }
 0x408   : > { %v1381_v11 = vpop.eup %1380 }
 0x409   : > { %v1383_v13 = vpop.eup %1382  ;;  %v916_v14 = vadd.f32 1.0, %v1381_v11 }
 0x40a   : > { %v915_v15 = vadd.f32 1.0, %v1383_v13 }
 0x40b   : > { %1388 = vrcp.f32 %v916_v14 }
 0x40c   : > { %1390 = vrcp.f32 %v915_v15 }
 0x40d   : > { %v1385_v17 = vpop.eup %1384 }
 0x40e   : > { %v1387_v19 = vpop.eup %1386  ;;  %v966_v21 = vsub.f32 1.0, %v1385_v17  ;;  %v962_v26 = vmul.f32 %v1385_v17, %v938_v23 }
 0x40f   : > { %v965_v24 = vsub.f32 1.0, %v1387_v19  ;;  %v961_v28 = vmul.f32 %v1387_v19, %v937_v25 }
 0x410   : > { %v970_v27 = vmul.f32 %v966_v21, %v958_v18 }
 0x411   : > { %v969_v30 = vmul.f32 %v965_v24, %v957_v22 }
 0x412   : > { %v974_v48 = vadd.f32 %v970_v27, %v962_v26 }
 0x413   : > { %v973_v32 = vadd.f32 %v969_v30, %v961_v28 }
 0x414   : > { %978 = vst.msk [vmem:[%s304_s27 + $0x8] sm:$0xff] %vm779_vm7, %v974_v48 }
 0x415   : > { %v1389_v47 = vpop.eup %1388  ;;  %977 = vst.msk [vmem:[%s304_s27] sm:$0xff] %vm779_vm7, %v973_v32 }
 0x416   : > { %v1391_v59 = vpop.eup %1390  ;;  %v968_v34 = vsub.f32 1.0, %v1389_v47  ;;  %v964_v38 = vmul.f32 %v1389_v47, %v940_v35 }
 0x417   : > { %v967_v36 = vsub.f32 1.0, %v1391_v59  ;;  %v963_v40 = vmul.f32 %v1391_v59, %v939_v37 }
 0x418   : > { %v972_v39 = vmul.f32 %v968_v34, %v960_v3 }
 0x419   : > { %v971_v51 = vmul.f32 %v967_v36, %v959_v0 }
 0x41a   : > { %v976_v41 = vadd.f32 %v972_v39, %v964_v38 }
 0x41b   : > { %v975_v50 = vadd.f32 %v971_v51, %v963_v40 }
 0x41c   : > { %980 = vst.msk [vmem:[%s304_s27 + $0x18] sm:$0xff] %vm779_vm7, %v976_v41 }
 0x41d   : > { %979 = vst.msk [vmem:[%s304_s27 + $0x10] sm:$0xff] %vm779_vm7, %v975_v50 }
 0x41e   : > { %1435 = shalt.err (!%p1432_p4)
}
 0x41f   : > { %s1436_s12 = scalar_lea.hbm %s1846_s16, 512  ;;  %s1440_s25 = scalar_lea.hbm %s1904_s5, 1024 }
 0x420   : > { %p1437_p7 = scmp.ne.s32.totalorder %s1846_s16, %s1436_s12  ;;  %p1441_p1 = scmp.lt.u32.totalorder %s1846_s16, %s1904_s5 }
 0x421   : > { %p1442_p3 = scmp.lt.u32.totalorder %s1440_s25, %s1436_s12  ;;  %p1444_p8 = scmp.lt.u32.totalorder %s1436_s12, %s1846_s16 }
 0x422   : > { %p1438_p10 = pnand %p1437_p7, %p1912_p11 }
 0x423   : > { %p1443_p9 = por %p1442_p3, %p1441_p1 }
 0x424   : > { %p1439_p12 = pneg %p1438_p10 }
 0x425   : > { %p1445_p0 = por %p1444_p8, %p1443_p9 }
 0x427   : > { %p1446_p6 = pnand %p1445_p0, %p1439_p12 }
 0x429   : > { %1449 = shalt.err (!%p1446_p6)
}
 0x42a   : > { %s1514_s11 = smov 128   ;;  %s1515_s14 = smov 8  }
 0x42b   : > { %1276 = dma.vmem_to_hbm [thread:$0]  (%p1912_p11), %s1848_s28, 512, %s1846_s16, %s982_s21, %s1514_s11, %s1514_s11, %s1515_s14  }
 0x42c PF: > { %s1013_s17 = sand.u32 1, %s1484_s18   ;;  %p1913_p13 = scmp.ne.s32.totalorder %s1909_s8, 0 }
 0x42d   : > { %p1914_p2 = scmp.ge.s32.totalorder %s1504_s23, 2  ;;  %s1014_s30 = scalar_lea.sflag [#allocation4], %s1013_s17 }
 0x42f   : > { %p1283_p5 = pnand %p1914_p2, %p1913_p13 }
 0x431   : > { %1479 = dma.done.wait (!%p1283_p5), %s1014_s30, 512  }
 0x432   : > { %1481 = vsyncadd (!%p1283_p5), %s1014_s30, 4294966784  ;;  %s21_s23 = sadd.s32 1, %s1504_s23   ;;  %s1915_s18 = smov %s1488_s19 }
 0x433   : > { %p18_p4 = scmp.ge.s32.totalorder %s21_s23, 4   ;;  %s1916_s19 = smov %s1492_s20 }
 0x434   : > { %s1917_s20 = smov %s1602_s7  ;;  %s1918_s21 = smov %s1500_s22 }
 0x435   : > { %s1919_s22 = smov %s1921_s26  ;;  %20 = sbr.rel (!%p18_p4) target bundleno = 6 (0x6), region = 91 }
 0x43c   :  { %1019 = vsyncpa [#allocation3], 1 }
 0x43d   :  { %1021 = vsyncpa [#allocation3 + $0x1], 1 }
 0x43e   :  { %1022 = vsyncpa [#allocation4], 1 }
 0x43f   :  { %1024 = vsyncpa [#allocation4 + $0x1], 1 }

</bundles_post_ra>
